<compile_context>
chip_gen: v6e
topology: v6e:2x2x1
jax: 0.10.0
libtpu: 0.0.40
codegen_flags: <defaults>
</compile_context>

<pallas_src>
import jax
import jax.numpy as jnp
from jax.experimental import pallas as pl
from jax.experimental.pallas import tpu as pltpu


def _make_fused_kernel(n_layers, compute_dtype):
    """Build the fused kernel body for `n_layers` ConcatLinear layers.

    Kernel ref layout (positional):
      t_ref  : SMEM (1,)                 scalar time t
      x_ref  : VMEM (block_b, Din0)      input activations (batch tile)
      then per layer i:
        wx_i : VMEM (Din_i, Dout_i)      weight (x part), pre-transposed to (in, out)
        wtb_i: VMEM (2, Dout_i)          row 0 = w_t (time column), row 1 = bias
      o_ref  : VMEM (block_b, Dout_last) output
    """

    def kernel(t_ref, x_ref, *refs):
        o_ref = refs[-1]
        t = t_ref[0]
        h = x_ref[...]  # f32
        for i in range(n_layers):
            wx = refs[2 * i][...]
            wtb = refs[2 * i + 1][...]
            # Fold the concatenated time column into the bias (f32 epilogue, v5e-safe).
            b_eff = t * wtb[0:1, :] + wtb[1:2, :]
            y = jnp.dot(
                h.astype(compute_dtype),
                wx.astype(compute_dtype),
                preferred_element_type=jnp.float32,
            )
            y = y + b_eff
            if i < n_layers - 1:
                # softplus = log(1 + exp(y)), numerically stable form
                y = jnp.logaddexp(y, jnp.zeros_like(y))
            h = y
        o_ref[...] = h.astype(o_ref.dtype)

    return kernel


def preprocess_params(params, compute_dtype=jnp.float32):
    """One-time weight preprocessing (hoisted out of the ODE-solver hot path).

    params: list of (w, b) with PyTorch nn.Linear layout w: (Dout, Din+1), b: (Dout,).
    Returns list of (wx, wtb) with wx: (Din, Dout) in `compute_dtype`,
    wtb: (2, Dout) f32 where row 0 is the time column w_t and row 1 is the bias.
    """
    prepped = []
    for w, b in params:
        wx = jnp.asarray(w[:, 1:].T, dtype=compute_dtype)            # (Din, Dout)
        wtb = jnp.stack([w[:, 0], b], axis=0).astype(jnp.float32)    # (2, Dout)
        prepped.append((wx, wtb))
    return prepped


def odenet_forward(t, x, prepped, *, compute_dtype=jnp.float32, max_block_b=512):
    """Fused ODEnet forward: one pallas_call for all layers.

    t       : scalar (float)
    x       : (B, Din0) float32
    prepped : output of preprocess_params
    """
    B, Din0 = x.shape
    n_layers = len(prepped)
    Dout_last = prepped[-1][0].shape[1]

    # Batch tiling: single block for small B; parallel blocks for large B (v7x has 2 TCs).
    block_b = B if B <= max_block_b else max_block_b
    if B % block_b != 0:
        block_b = B  # keep semantics trivially exact for ragged batches
    grid = (B // block_b,)

    t_arr = jnp.asarray(t, jnp.float32).reshape(1)

    in_specs = [
        pl.BlockSpec(memory_space=pltpu.SMEM),              # t (scalar in SMEM)
        pl.BlockSpec((block_b, Din0), lambda i: (i, 0)),    # x, batch-tiled
    ]
    flat_inputs = [t_arr, x]
    for wx, wtb in prepped:
        din, dout = wx.shape
        in_specs.append(pl.BlockSpec((din, dout), lambda i: (0, 0)))  # full weight resident
        in_specs.append(pl.BlockSpec((2, dout), lambda i: (0, 0)))    # [w_t; b]
        flat_inputs.extend([wx, wtb])

    kernel = _make_fused_kernel(n_layers, compute_dtype)
    return pl.pallas_call(
        kernel,
        out_shape=jax.ShapeDtypeStruct((B, Dout_last), jnp.float32),
        grid=grid,
        in_specs=in_specs,
        out_specs=pl.BlockSpec((block_b, Dout_last), lambda i: (i, 0)),
        compiler_params=pltpu.CompilerParams(dimension_semantics=("parallel",)),
    )(*flat_inputs)


def init_odenet_params(key, in_dim, hidden_dims, out_dim):
    """Deterministic init mimicking nn.Linear defaults: U(-1/sqrt(fan_in), 1/sqrt(fan_in)).

    Each ConcatLinear layer i maps dims[i] -> dims[i+1] with weight (dims[i+1], dims[i]+1).
    """
    if isinstance(hidden_dims, int):
        hidden_dims = [hidden_dims]
    dims = [in_dim] + list(hidden_dims) + [out_dim]
    params = []
    for i in range(len(dims) - 1):
        fan_in = dims[i] + 1
        bound = 1.0 / jnp.sqrt(jnp.float32(fan_in))
        key, kw, kb = jax.random.split(key, 3)
        w = jax.random.uniform(kw, (dims[i + 1], fan_in), jnp.float32, -bound, bound)
        b = jax.random.uniform(kb, (dims[i + 1],), jnp.float32, -bound, bound)
        params.append((w, b))
    return params


def odenet_forward_ref(t, x, params):
    """Pure-JAX reference (matches the PyTorch module) for validation."""
    n = len(params)
    for i, (w, b) in enumerate(params):
        tt = jnp.full((x.shape[0], 1), t, x.dtype)
        ttx = jnp.concatenate([tt, x], axis=1)
        x = ttx @ w.T + b
        if i < n - 1:
            x = jnp.logaddexp(x, 0.0)
    return x


if __name__ == "__main__":
    key = jax.random.PRNGKey(0)
    key, kx = jax.random.split(key)

    # Small shapes consistent with a linear ('concat') ODEnet:
    # batch=8, in_dim=16, hidden=[32, 32], out_dim=16
    B, in_dim, hidden_dims, out_dim = 8, 16, [32, 32], 16
    x = jax.random.normal(kx, (B, in_dim), jnp.float32)
    t = jnp.float32(0.5)

    params = init_odenet_params(key, in_dim, hidden_dims, out_dim)
    # Hoisted, one-time preprocessing (NOT in the per-ODE-step hot path).
    prepped = preprocess_params(params)

    # jit to mimic how an ODE solver would call the RHS repeatedly.
    fwd = jax.jit(odenet_forward)
    out = jax.block_until_ready(fwd(t, x, prepped))

    ref = odenet_forward_ref(t, x, params)
    assert out.shape == (B, out_dim)
    assert jnp.allclose(out, ref, atol=1e-5, rtol=1e-5), "mismatch vs reference"

    print("KERNEL_OK")
</pallas_src>

<mosaic_0001>
module attributes {stable_mosaic.version = 11 : i64} {
  func.func @kernel(%arg0: i32, %arg1: memref<1xf32, #tpu.memory_space<smem>>, %arg2: memref<8x16xf32, #tpu.memory_space<vmem>>, %arg3: memref<16x32xf32, #tpu.memory_space<vmem>>, %arg4: memref<2x32xf32, #tpu.memory_space<vmem>>, %arg5: memref<32x32xf32, #tpu.memory_space<vmem>>, %arg6: memref<2x32xf32, #tpu.memory_space<vmem>>, %arg7: memref<32x16xf32, #tpu.memory_space<vmem>>, %arg8: memref<2x16xf32, #tpu.memory_space<vmem>>, %arg9: memref<8x16xf32, #tpu.memory_space<vmem>>) attributes {dimension_semantics = [#tpu.dimension_semantics<parallel>], iteration_bounds = array<i64: 1>, scalar_prefetch = 0 : i64, scratch_operands = 0 : i64, tpu.core_type = #tpu.core_type<tc>, window_params = [{transform_indices = @transform_0, window_bounds = array<i64: 1>}, {transform_indices = @transform_1, window_bounds = array<i64: 8, 16>}, {pipeline_mode = #tpu.pipeline_mode<synchronous>, transform_indices = @transform_2, window_bounds = array<i64: 16, 32>}, {pipeline_mode = #tpu.pipeline_mode<synchronous>, transform_indices = @transform_3, window_bounds = array<i64: 2, 32>}, {pipeline_mode = #tpu.pipeline_mode<synchronous>, transform_indices = @transform_4, window_bounds = array<i64: 32, 32>}, {pipeline_mode = #tpu.pipeline_mode<synchronous>, transform_indices = @transform_5, window_bounds = array<i64: 2, 32>}, {pipeline_mode = #tpu.pipeline_mode<synchronous>, transform_indices = @transform_6, window_bounds = array<i64: 32, 16>}, {pipeline_mode = #tpu.pipeline_mode<synchronous>, transform_indices = @transform_7, window_bounds = array<i64: 2, 16>}, {transform_indices = @transform_8, window_bounds = array<i64: 8, 16>}]} {
    %c0 = arith.constant 0 : index
    %0 = memref.load %arg1[%c0] : memref<1xf32, #tpu.memory_space<smem>>
    %c0_0 = arith.constant 0 : index
    %c0_1 = arith.constant 0 : index
    %1 = vector.load %arg2[%c0_0, %c0_1] : memref<8x16xf32, #tpu.memory_space<vmem>>, vector<8x16xf32>
    %c0_2 = arith.constant 0 : index
    %c0_3 = arith.constant 0 : index
    %2 = vector.load %arg3[%c0_2, %c0_3] : memref<16x32xf32, #tpu.memory_space<vmem>>, vector<16x32xf32>
    %c0_4 = arith.constant 0 : index
    %c0_5 = arith.constant 0 : index
    %3 = vector.load %arg4[%c0_4, %c0_5] : memref<2x32xf32, #tpu.memory_space<vmem>>, vector<2x32xf32>
    %4 = vector.extract_strided_slice %3 {offsets = [0, 0], sizes = [1, 32], strides = [1, 1]} : vector<2x32xf32> to vector<1x32xf32>
    %5 = vector.broadcast %0 : f32 to vector<1x32xf32>
    %6 = arith.mulf %5, %4 : vector<1x32xf32>
    %7 = vector.extract_strided_slice %3 {offsets = [1, 0], sizes = [1, 32], strides = [1, 1]} : vector<2x32xf32> to vector<1x32xf32>
    %8 = arith.addf %6, %7 : vector<1x32xf32>
    %cst = arith.constant dense<0.000000e+00> : vector<8x32xf32>
    %9 = tpu.matmul %1, %2, %cst {dimension_numbers = #tpu.dot_dimension_numbers<[1], [0], [0], [1], [0, 0, 1, 1], [], []>} : vector<8x16xf32>, vector<16x32xf32>, vector<8x32xf32> -> vector<8x32xf32>
    %10 = vector.broadcast %8 : vector<1x32xf32> to vector<8x32xf32>
    %11 = arith.addf %9, %10 : vector<8x32xf32>
    %cst_6 = arith.constant 0.000000e+00 : f32
    %12 = vector.broadcast %cst_6 : f32 to vector<8x32xf32>
    %13 = arith.maximumf %11, %12 : vector<8x32xf32>
    %14 = arith.subf %11, %12 : vector<8x32xf32>
    %15 = arith.cmpf one, %14, %14 : vector<8x32xf32>
    %16 = arith.addf %11, %12 : vector<8x32xf32>
    %17 = math.absf %14 : vector<8x32xf32>
    %cst_7 = arith.constant 0.000000e+00 : f32
    %18 = vector.broadcast %cst_7 : f32 to vector<8x32xf32>
    %19 = arith.subf %18, %17 : vector<8x32xf32>
    %20 = math.exp %19 : vector<8x32xf32>
    %21 = math.log1p %20 : vector<8x32xf32>
    %22 = arith.addf %13, %21 : vector<8x32xf32>
    %23 = arith.select %15, %16, %22 : vector<8x32xi1>, vector<8x32xf32>
    %c0_8 = arith.constant 0 : index
    %c0_9 = arith.constant 0 : index
    %24 = vector.load %arg5[%c0_8, %c0_9] : memref<32x32xf32, #tpu.memory_space<vmem>>, vector<32x32xf32>
    %c0_10 = arith.constant 0 : index
    %c0_11 = arith.constant 0 : index
    %25 = vector.load %arg6[%c0_10, %c0_11] : memref<2x32xf32, #tpu.memory_space<vmem>>, vector<2x32xf32>
    %26 = vector.extract_strided_slice %25 {offsets = [0, 0], sizes = [1, 32], strides = [1, 1]} : vector<2x32xf32> to vector<1x32xf32>
    %27 = vector.broadcast %0 : f32 to vector<1x32xf32>
    %28 = arith.mulf %27, %26 : vector<1x32xf32>
    %29 = vector.extract_strided_slice %25 {offsets = [1, 0], sizes = [1, 32], strides = [1, 1]} : vector<2x32xf32> to vector<1x32xf32>
    %30 = arith.addf %28, %29 : vector<1x32xf32>
    %cst_12 = arith.constant dense<0.000000e+00> : vector<8x32xf32>
    %31 = tpu.matmul %23, %24, %cst_12 {dimension_numbers = #tpu.dot_dimension_numbers<[1], [0], [0], [1], [0, 0, 1, 1], [], []>} : vector<8x32xf32>, vector<32x32xf32>, vector<8x32xf32> -> vector<8x32xf32>
    %32 = vector.broadcast %30 : vector<1x32xf32> to vector<8x32xf32>
    %33 = arith.addf %31, %32 : vector<8x32xf32>
    %cst_13 = arith.constant 0.000000e+00 : f32
    %34 = vector.broadcast %cst_13 : f32 to vector<8x32xf32>
    %35 = arith.maximumf %33, %34 : vector<8x32xf32>
    %36 = arith.subf %33, %34 : vector<8x32xf32>
    %37 = arith.cmpf one, %36, %36 : vector<8x32xf32>
    %38 = arith.addf %33, %34 : vector<8x32xf32>
    %39 = math.absf %36 : vector<8x32xf32>
    %cst_14 = arith.constant 0.000000e+00 : f32
    %40 = vector.broadcast %cst_14 : f32 to vector<8x32xf32>
    %41 = arith.subf %40, %39 : vector<8x32xf32>
    %42 = math.exp %41 : vector<8x32xf32>
    %43 = math.log1p %42 : vector<8x32xf32>
    %44 = arith.addf %35, %43 : vector<8x32xf32>
    %45 = arith.select %37, %38, %44 : vector<8x32xi1>, vector<8x32xf32>
    %c0_15 = arith.constant 0 : index
    %c0_16 = arith.constant 0 : index
    %46 = vector.load %arg7[%c0_15, %c0_16] : memref<32x16xf32, #tpu.memory_space<vmem>>, vector<32x16xf32>
    %c0_17 = arith.constant 0 : index
    %c0_18 = arith.constant 0 : index
    %47 = vector.load %arg8[%c0_17, %c0_18] : memref<2x16xf32, #tpu.memory_space<vmem>>, vector<2x16xf32>
    %48 = vector.extract_strided_slice %47 {offsets = [0, 0], sizes = [1, 16], strides = [1, 1]} : vector<2x16xf32> to vector<1x16xf32>
    %49 = vector.broadcast %0 : f32 to vector<1x16xf32>
    %50 = arith.mulf %49, %48 : vector<1x16xf32>
    %51 = vector.extract_strided_slice %47 {offsets = [1, 0], sizes = [1, 16], strides = [1, 1]} : vector<2x16xf32> to vector<1x16xf32>
    %52 = arith.addf %50, %51 : vector<1x16xf32>
    %cst_19 = arith.constant dense<0.000000e+00> : vector<8x16xf32>
    %53 = tpu.matmul %45, %46, %cst_19 {dimension_numbers = #tpu.dot_dimension_numbers<[1], [0], [0], [1], [0, 0, 1, 1], [], []>} : vector<8x32xf32>, vector<32x16xf32>, vector<8x16xf32> -> vector<8x16xf32>
    %54 = vector.broadcast %52 : vector<1x16xf32> to vector<8x16xf32>
    %55 = arith.addf %53, %54 : vector<8x16xf32>
    %c0_20 = arith.constant 0 : index
    %c0_21 = arith.constant 0 : index
    %56 = vector.load %arg9[%c0_20, %c0_21] : memref<8x16xf32, #tpu.memory_space<vmem>>, vector<8x16xf32>
    tpu.vector_store %arg9[%c0_20, %c0_21], %55 {strides = array<i32>} : memref<8x16xf32, #tpu.memory_space<vmem>>, vector<8x16xf32>,
    return
  }
  func.func @transform_0(%arg0: i32) -> i32 {
    %c0_i32 = arith.constant 0 : i32
    %c0_i32_0 = arith.constant 0 : i32
    return %c0_i32 : i32
  }
  func.func @transform_1(%arg0: i32) -> (i32, i32) {
    %c0_i32 = arith.constant 0 : i32
    %c0_i32_0 = arith.constant 0 : i32
    return %arg0, %c0_i32 : i32, i32
  }
  func.func @transform_2(%arg0: i32) -> (i32, i32) {
    %c0_i32 = arith.constant 0 : i32
    %c0_i32_0 = arith.constant 0 : i32
    %c0_i32_1 = arith.constant 0 : i32
    return %c0_i32, %c0_i32_0 : i32, i32
  }
  func.func @transform_3(%arg0: i32) -> (i32, i32) {
    %c0_i32 = arith.constant 0 : i32
    %c0_i32_0 = arith.constant 0 : i32
    %c0_i32_1 = arith.constant 0 : i32
    return %c0_i32, %c0_i32_0 : i32, i32
  }
  func.func @transform_4(%arg0: i32) -> (i32, i32) {
    %c0_i32 = arith.constant 0 : i32
    %c0_i32_0 = arith.constant 0 : i32
    %c0_i32_1 = arith.constant 0 : i32
    return %c0_i32, %c0_i32_0 : i32, i32
  }
  func.func @transform_5(%arg0: i32) -> (i32, i32) {
    %c0_i32 = arith.constant 0 : i32
    %c0_i32_0 = arith.constant 0 : i32
    %c0_i32_1 = arith.constant 0 : i32
    return %c0_i32, %c0_i32_0 : i32, i32
  }
  func.func @transform_6(%arg0: i32) -> (i32, i32) {
    %c0_i32 = arith.constant 0 : i32
    %c0_i32_0 = arith.constant 0 : i32
    %c0_i32_1 = arith.constant 0 : i32
    return %c0_i32, %c0_i32_0 : i32, i32
  }
  func.func @transform_7(%arg0: i32) -> (i32, i32) {
    %c0_i32 = arith.constant 0 : i32
    %c0_i32_0 = arith.constant 0 : i32
    %c0_i32_1 = arith.constant 0 : i32
    return %c0_i32, %c0_i32_0 : i32, i32
  }
  func.func @transform_8(%arg0: i32) -> (i32, i32) {
    %c0_i32 = arith.constant 0 : i32
    %c0_i32_0 = arith.constant 0 : i32
    return %arg0, %c0_i32 : i32, i32
  }
}

</mosaic_0001>

<bundles_post_ra>
// kernel: odenet_forward.1
= control target key start
LH: loop header
LB: loop body
LE: loop exit
PB: predicated region body
PF: predicated region fallthrough
CT: control target
= control target key end

     0   :  { %14 = vsyncpa [#allocation4], 0  ;;  %s584_s0 = inlined_call_operand.<no memory space> [shape: f32[1], index: 0, kind: input, shape index: {}]   ;;  %s585_s1 = inlined_call_operand.vmem [shape: f32[8,16], index: 1, kind: input, shape index: {}]   ;;  %s586_s2 = inlined_call_operand.vmem [shape: f32[16,32], index: 2, kind: input, shape index: {}]   ;;  %s587_s3 = inlined_call_operand.hbm [shape: f32[2,32], index: 3, kind: input, shape index: {}]   ;;  %s588_s4 = inlined_call_operand.vmem [shape: f32[32,32], index: 4, kind: input, shape index: {}]   ;;  %s589_s5 = inlined_call_operand.vmem [shape: f32[2,32], index: 5, kind: input, shape index: {}]   ;;  %s590_s6 = inlined_call_operand.vmem [shape: f32[32,16], index: 6, kind: input, shape index: {}]   ;;  %s591_s7 = inlined_call_operand.vmem [shape: f32[2,16], index: 7, kind: input, shape index: {}]   ;;  %s592_s8 = inlined_call_operand.hbm [shape: f32[8,16], index: 8, kind: output, shape index: {}]  }
   0x1   :  { %15 = vsyncpa [#allocation5], 0  ;;  %s460_s27 = smov [#allocation3]  }
   0x2   :  { %s28_s28 = sshll.u32 %s460_s27, 4  ;;  %s29_s28 = int_to_ptr.vmem [resolvable:$true] %s28_s28 }
   0x3   :  { %s424_s29 = scalar_lea.vmem %s29_s28, 32  ;;  %p429_p1 = scmp.lt.s32.totalorder %s29_s28, %s29_s28 }
   0x4   :  { %p425_p0 = scmp.ne.s32.totalorder %s29_s28, %s424_s29  ;;  %p430_p2 = scmp.lt.s32.totalorder %s424_s29, %s424_s29 }
   0x6   :  { %p431_p3 = por %p430_p2, %p429_p1 }
   0x8   :  { %p432_p4 = pnand %p431_p3, %p425_p0 }
   0xa   :  { %435 = shalt.err (!%p432_p4)
}
   0xb   :  { %31 = dma.hbm_to_vmem [thread:$0]  %s587_s3, 32, %s29_s28, [#allocation4]  }
   0xc   :  { %456 = dma.done.wait [#allocation4], 32  }
   0xd   :  { %457 = vsyncadd [#allocation4], 4294967264  ;;  %v461_v0 = vmov 0.0   ;;  %vm462_vm0 = vmmov 0   ;;  %v46_v1 = vld [vmem:[%s586_s2 + $0x8] sm:$0xff]  ;;  %v45_v2 = vld [vmem:[%s586_s2] sm:$0xff]  ;;  %v54_v8 = vlaneseq  ;;  %v547_v10 = vstv %s584_s0 }
   0xe   :  { %375 = vmatprep.subr.mxu0 %v461_v0  ;;  %379 = vmatprep.mubr.msk.f32.mxu0 %vm462_vm0, %v461_v0  ;;  %v44_v3 = vld [vmem:[%s585_s1] sm:$0xff]  ;;  %vm58_vm1 = vcmask 130048   ;;  %v153_v4 = vld [vmem:[%s588_s4 + $0x18] sm:$0xff]  ;;  %v152_v5 = vld [vmem:[%s588_s4 + $0x10] sm:$0xff]  ;;  %vm164_vm3 = vcmask 261120   ;;  %s463_s9 = smov [#allocation6]  }
   0xf   :  { %382 = vmatprep.subr.mxu1 %v461_v0  ;;  %390 = vmatprep.mubr.msk.f32.mxu1 %vm462_vm0, %v461_v0  ;;  %v151_v6 = vld [vmem:[%s588_s4 + $0x8] sm:$0xff]  ;;  %v150_v7 = vld [vmem:[%s588_s4] sm:$0xff]  ;;  %v55_v13 = vshrl.u32 %v54_v8, 7  ;;  %v259_v35 = vld [vmem:[%s590_s6 + $0x18] sm:$0xff]  ;;  %s350_s10 = sshll.u32 %s463_s9, 4  ;;  %s351_s10 = int_to_ptr.vmem [resolvable:$true] %s350_s10 }
  0x10   :  { %376 = vmatpush3.msra.mxu0 %v46_v1  ;;  %383 = vmatpush3.msra.mxu1 %v153_v4  ;;  %v47_v9 = vld [vmem:[#allocation3] sm:$0x3]  ;;  %v258_v36 = vld [vmem:[%s590_s6 + $0x10] sm:$0xff]  ;;  %v257_v37 = vld [vmem:[%s590_s6 + $0x8] sm:$0xff]  ;;  %s436_s11 = scalar_lea.vmem %s351_s10, 128  ;;  %p441_p6 = scmp.lt.s32.totalorder %s351_s10, %s351_s10 }
  0x11   :  { %377 = vmatprep.subr.mxu0 %v461_v0  ;;  %384 = vmatprep.subr.mxu1 %v461_v0  ;;  %v49_v11 = vmul.f32 %v547_v10, %v47_v9  ;;  %v51_v12 = vrot.slane %v47_v9, 1  ;;  %v550_v15 = vsub.s32 0, %v55_v13  ;;  %v256_v38 = vld [vmem:[%s590_s6] sm:$0xff]  ;;  %p437_p5 = scmp.ne.s32.totalorder %s351_s10, %s436_s11  ;;  %p442_p7 = scmp.lt.s32.totalorder %s436_s11, %s436_s11 }
  0x12   :  { %378 = vmatpush3.msra.mxu0 %v45_v2  ;;  %385 = vmatpush3.msra.mxu1 %v152_v5  ;;  %v154_v39 = vld [vmem:[%s589_s5] sm:$0x3] }
  0x13   :  { %380 = vmatmul.mubr.msk.f32.vlgmr.msra.gmra.mxu0 %vm58_vm1, %v44_v3  ;;  %393 = vmatprep.subr.mxu0 %v461_v0  ;;  %v53_v14 = vadd.f32 %v51_v12, %v49_v11  ;;  %v155_v40 = vmul.f32 %v154_v39, %v547_v10  ;;  %v157_v41 = vrot.slane %v154_v39, 1  ;;  %v260_v62 = vld [vmem:[%s591_s7] sm:$0x3]  ;;  %p443_p8 = por %p442_p7, %p441_p6 }
  0x14   :  { %401 = vmatprep.mubr.msk.f32.mxu0 %vm462_vm0, %v461_v0  ;;  %386 = vmatprep.subr.mxu1 %v461_v0  ;;  %v261_v63 = vmul.f32 %v260_v62, %v547_v10 }
  0x15   :  { %387 = vmatpush3.msra.mxu1 %v151_v6  ;;  %v57_v16 = vrot.slane %v53_v14, %v550_v15  ;;  %394 = vmatpush3.msra.mxu0 %v259_v35  ;;  %v159_v42 = vadd.f32 %v157_v41, %v155_v40  ;;  %p444_p9 = pnand %p443_p8, %p437_p5 }
  0x16   :  { %388 = vmatprep.subr.mxu1 %v461_v0  ;;  %395 = vmatprep.subr.mxu0 %v461_v0 }
  0x17   :  { %389 = vmatpush3.msra.mxu1 %v150_v7  ;;  %396 = vmatpush3.msra.mxu0 %v258_v36  ;;  %v163_v43 = vrot.slane %v159_v42, %v550_v15 }
  0x18   :  { %397 = vmatprep.subr.mxu0 %v461_v0 }
  0x19   :  { %398 = vmatpush3.msra.mxu0 %v257_v37 }
  0x1a   :  { %399 = vmatprep.subr.mxu0 %v461_v0  ;;  %v263_v0 = vrot.slane %v260_v62, 1 }
  0x1b   :  { %400 = vmatpush3.msra.mxu0 %v256_v38 }
  0x1c   :  { %v265_v1 = vadd.f32 %v263_v0, %v261_v63 }
  0x1e   :  { %v269_v2 = vrot.slane %v265_v1, %v550_v15 }
  0xd3   :  { %v128_v17 = vpop.f32.mrf.mxu0 }
  0xd4   :  { %v129_v18 = vadd.f32 %v128_v17, %v57_v16 }
  0xd5   :  { %v381_v19 = vpop.f32.mrf.mxu0 }
  0xd6   :  { %v135_v20 = vand.u32 2147483647, %v129_v18  ;;  %v132_v31 = vmax.f32 %v129_v18, 0.0  ;;  %vm133_vm4 = vcmp.ne.f32.partialorder %v129_v18, %v129_v18 }
  0xd8   :  { %v136_v21 = vsub.f32 0.0, %v135_v20 }
  0xda   :  { %v137_v22 = vmul.f32 1.442695, %v136_v21 }
  0xdc   :  { %408 = vpow2.f32 %v137_v22 }
  0xe9   :  { %v409_v23 = vpop.eup %408 }
  0xea   :  { %v139_v24 = vadd.f32 1.0, %v409_v23  ;;  %v142_v25 = vmul.f32 -0.5, %v409_v23  ;;  %v145_v27 = vand.u32 2147483647, %v409_v23 }
  0xec   :  { %410 = vlog2.f32 %v139_v24  ;;  %v143_v26 = vadd.f32 1.0, %v142_v25  ;;  %vm146_vm2 = vcmp.lt.f32.partialorder %v145_v27, 0.0004427343 }
  0xee   :  { %v144_v30 = vmul.f32 %v409_v23, %v143_v26 }
  0xf9   :  { %v411_v28 = vpop.eup %410 }
  0xfa   :  { %v141_v29 = vmul.f32 0.6931472, %v411_v28 }
  0xfc   :  { %v147_v32 = vsel %vm146_vm2, %v144_v30, %v141_v29 }
  0xfd   :  { %v148_v33 = vadd.f32 %v147_v32, %v132_v31 }
  0xff   :  { %v149_v34 = vsel %vm133_vm4, %v129_v18, %v148_v33 }
 0x100   :  { %391 = vmatmul.mubr.msk.f32.vlgmr.msra.gmra.mxu1 %vm164_vm3, %v149_v34 }
 0x1c0   :  { %v234_v44 = vpop.f32.mrf.mxu1 }
 0x1c1   :  { %v235_v45 = vadd.f32 %v234_v44, %v163_v43 }
 0x1c2   :  { %v392_v46 = vpop.f32.mrf.mxu1 }
 0x1c3   :  { %v241_v47 = vand.u32 2147483647, %v235_v45  ;;  %v238_v58 = vmax.f32 %v235_v45, 0.0  ;;  %vm239_vm6 = vcmp.ne.f32.partialorder %v235_v45, %v235_v45 }
 0x1c5   :  { %v242_v48 = vsub.f32 0.0, %v241_v47 }
 0x1c7   :  { %v243_v49 = vmul.f32 1.442695, %v242_v48 }
 0x1c9   :  { %412 = vpow2.f32 %v243_v49 }
 0x1d6   :  { %v413_v50 = vpop.eup %412 }
 0x1d7   :  { %v245_v51 = vadd.f32 1.0, %v413_v50  ;;  %v248_v52 = vmul.f32 -0.5, %v413_v50  ;;  %v251_v54 = vand.u32 2147483647, %v413_v50 }
 0x1d9   :  { %414 = vlog2.f32 %v245_v51  ;;  %v249_v53 = vadd.f32 1.0, %v248_v52  ;;  %vm252_vm5 = vcmp.lt.f32.partialorder %v251_v54, 0.0004427343 }
 0x1db   :  { %v250_v57 = vmul.f32 %v413_v50, %v249_v53 }
 0x1e6   :  { %v415_v55 = vpop.eup %414 }
 0x1e7   :  { %v247_v56 = vmul.f32 0.6931472, %v415_v55 }
 0x1e9   :  { %v253_v59 = vsel %vm252_vm5, %v250_v57, %v247_v56 }
 0x1ea   :  { %v254_v60 = vadd.f32 %v253_v59, %v238_v58 }
 0x1ec   :  { %v255_v61 = vsel %vm239_vm6, %v235_v45, %v254_v60 }
 0x1ed   :  { %402 = vmatmul.mubr.msk.f32.vlgmr.msra.gmra.mxu0 %vm164_vm3, %v255_v61 }
 0x2ad   :  { %v339_v3 = vpop.f32.mrf.mxu0 }
 0x2ae   :  { %v340_v4 = vadd.f32 %v339_v3, %v269_v2 }
 0x2af   :  { %v403_v5 = vpop.f32.mrf.mxu0 }
 0x2b0   :  { %343 = vst.msk [vmem:[#allocation6] sm:$0xff] %vm58_vm1, %v340_v4 }
 0x2b1   :  { %447 = shalt.err (!%p444_p9)
}
 0x2b2   :  { %353 = dma.vmem_to_hbm [thread:$0]  %s351_s10, 128, %s592_s8, [#allocation5]  }
 0x2b3   :  { %458 = dma.done.wait [#allocation5], 128  }
 0x2b4   :  { %459 = vsyncadd [#allocation5], 4294967168 }
 0x2b5   :  { %357 = vsyncpa [#allocation4], 1 }
 0x2b6   :  { %358 = vsyncpa [#allocation5], 1 }

</bundles_post_ra>
